<compile_context>
chip_gen: v5e
topology: v5e:2x2
jax: 0.10.0
libtpu: 0.0.40
codegen_flags: <defaults>
</compile_context>

<pallas_src>
import jax
import jax.numpy as jnp
from jax.experimental import pallas as pl
from jax.experimental.pallas import tpu as pltpu


def _round_up(x, m):
    return ((x + m - 1) // m) * m


def _cdiv(a, b):
    return (a + b - 1) // b


def policy_kernel(patch_ref, w_ref, b_ref, out_ref):
    # patch_ref : [64, TILE]  flattened patches, tokens on lanes
    # w_ref     : [1, 64]     fused weight  (w_emb @ w_head)^T
    # b_ref     : [1, 1]      fused bias    (b_emb @ w_head + b_head)
    # out_ref   : [1, TILE]   logits, lane-dense
    # Single MXU matvec: no [64, TILE] elementwise temp, no weight broadcast.
    out_ref[...] = (
        jnp.dot(w_ref[...], patch_ref[...], preferred_element_type=jnp.float32)
        + b_ref[...]
    )


def policy_model_forward(obs, params, patch_size, tile_bt=16384, fuse_input=True):
    """obs: [B, C, H, W] float32 (NCHW).  Returns logits [B, N_patches]."""
    B, C, H, W = obs.shape
    p = patch_size
    nH, nW = H // p, W // p
    N = nH * nW
    D = C * p * p  # = 64
    BT = B * N

    # --- glue: patchify into token-on-lanes layout [D, BT] ---
    # axis labels: (b, c, ih, ph, iw, pw) -> (c, ph, pw, b, ih, iw)
    # TODO(synk): deeper path is an in-kernel stride-p patchify (conv-style
    # BlockSpec pulling [C, row-band, W] slabs of obs, fused [C,p,p] weight
    # VMEM-resident); kept in XLA here, with the input-fusion hint below, to
    # keep the compile path conservative.
    x = obs.reshape(B, C, nH, p, nW, p).transpose(1, 3, 5, 0, 2, 4)
    patches_t = x.reshape(D, BT).astype(jnp.float32)

    # --- fuse the head into the embedding (exact up to f32 reassociation) ---
    w_fused = (params["w_emb"] @ params["w_head"]).T                    # [1, 64]
    b_fused = params["b_emb"] @ params["w_head"] + params["b_head"]     # [1, 1]

    # --- tile selection ---
    # * always a multiple of 128 (lane-dense blocks, unmasked stores)
    # * capped at 16384 lanes: 64*16384*4 B = 4 MiB input block, 8 MiB
    #   double-buffered -> fits v5e's 16 MiB scoped-VMEM default and v6e/v7x's
    #   32 MiB default without touching vmem_limit_bytes
    # * >= 2 tiles whenever BT allows it so v7x's two TensorCores split work
    target = max(128, min((int(tile_bt) // 128) * 128, 16384))
    bt_128 = _round_up(BT, 128)
    n_tiles = _cdiv(bt_128, target)
    if bt_128 >= 256:
        n_tiles = max(n_tiles, 2)
    tile = _round_up(_cdiv(bt_128, n_tiles), 128)
    n_tiles = _cdiv(BT, tile)
    BT_pad = n_tiles * tile
    if BT_pad != BT:
        patches_t = jnp.pad(patches_t, ((0, 0), (0, BT_pad - BT)))

    compiler_params = pltpu.CompilerParams(
        dimension_semantics=("parallel",),
        # Allow XLA to fuse the patchify reshape/transpose/pad producer chain
        # directly into the kernel's input read (weights are tiny: no fusion).
        allow_input_fusion=[True, False, False] if fuse_input else None,
    )

    out = pl.pallas_call(
        policy_kernel,
        out_shape=jax.ShapeDtypeStruct((1, BT_pad), jnp.float32),
        grid=(n_tiles,),
        in_specs=[
            pl.BlockSpec((D, tile), lambda i: (0, i)),   # patches: tiled over BT
            pl.BlockSpec((1, D), lambda i: (0, 0)),      # fused weight: VMEM-resident
            pl.BlockSpec((1, 1), lambda i: (0, 0)),      # fused bias:   VMEM-resident
        ],
        out_specs=pl.BlockSpec((1, tile), lambda i: (0, i)),
        compiler_params=compiler_params,
        cost_estimate=pl.CostEstimate(
            flops=2 * D * BT_pad,
            transcendentals=0,
            bytes_accessed=(D * BT_pad + BT_pad + D + 1) * 4),
    )(patches_t, w_fused, b_fused)

    # TODO(synk): bf16 input DMA (f32 accumulate) would halve HBM bytes on this
    # mem-bound kernel (~2x) but shifts numerics (~1e-2 rel); needs sign-off.
    return out[0, :BT].reshape(B, N)


def init_params(key, d_model=64):
    k1, k2, k3, k4 = jax.random.split(key, 4)
    # nn.Linear-style shapes: weight [out, in], bias [out]; stored transposed for x @ W.
    w_emb = jax.random.normal(k1, (d_model, d_model), jnp.float32) * 0.02
    b_emb = jax.random.normal(k2, (d_model,), jnp.float32) * 0.02
    w_head = jax.random.normal(k3, (1, d_model), jnp.float32) * 0.02
    b_head = jax.random.normal(k4, (1,), jnp.float32) * 0.02
    return {
        "w_emb": w_emb.T,                       # [64, 64]
        "b_emb": b_emb.reshape(1, d_model),     # [1, 64]
        "w_head": w_head.T,                     # [64, 1]
        "b_head": b_head.reshape(1, 1),         # [1, 1]
    }


def reference_forward(obs, params, patch_size):
    """Pure-JAX reference matching the PyTorch semantics (un-fused weights)."""
    B, C, H, W = obs.shape
    p = patch_size
    nH, nW = H // p, W // p
    N = nH * nW
    patches = obs.reshape(B, C, nH, p, nW, p).transpose(0, 2, 4, 1, 3, 5)
    patches = patches.reshape(B, N, C * p * p)
    tokens = patches @ params["w_emb"] + params["b_emb"]          # [B, N, 64]
    cls = jnp.zeros((B, 1, tokens.shape[-1]), tokens.dtype)       # CLS token (dropped)
    token_vecs = jnp.concatenate([cls, tokens], axis=1)           # [B, 1+N, 64]
    action_vecs = token_vecs[:, 1:, :]
    logits = action_vecs @ params["w_head"] + params["b_head"]    # [B, N, 1]
    return logits.squeeze(-1)


if __name__ == "__main__":
    key = jax.random.PRNGKey(0)
    k_obs, k_par = jax.random.split(key)

    # Small shapes: batch=2, channels=4, spatial=16x16, patch=4 -> 16 tokens of dim 64.
    B, C, H, W = 2, 4, 16, 16
    patch_size = 4
    obs = jax.random.normal(k_obs, (B, C, H, W), jnp.float32)
    params = init_params(k_par)

    fwd = jax.jit(policy_model_forward, static_argnums=(2, 3, 4))
    try:
        logits = fwd(obs, params, patch_size, 16384, True)
        jax.block_until_ready(logits)
    except Exception:
        # Conservative fallback if this compiler build rejects producer fusion
        # into the custom call: identical kernel, fusion hint disabled.
        logits = fwd(obs, params, patch_size, 16384, False)
        jax.block_until_ready(logits)

    ref = reference_forward(obs, params, patch_size)
    assert logits.shape == (B, (H // patch_size) * (W // patch_size))
    # Fusing w_emb @ w_head reassociates f32 sums; 1e-4 tolerance covers it.
    assert jnp.allclose(logits, ref, atol=1e-4, rtol=1e-4)

    print("KERNEL_OK")
</pallas_src>

<mosaic_0001>
module attributes {stable_mosaic.version = 11 : i64} {
  func.func @policy_kernel(%arg0: i32, %arg1: memref<64x128xf32, #tpu.memory_space<vmem>>, %arg2: memref<1x64xf32, #tpu.memory_space<vmem>>, %arg3: memref<1x1xf32, #tpu.memory_space<vmem>>, %arg4: memref<1x128xf32, #tpu.memory_space<vmem>>) attributes {dimension_semantics = [#tpu.dimension_semantics<parallel>], iteration_bounds = array<i64: 1>, scalar_prefetch = 0 : i64, scratch_operands = 0 : i64, tpu.core_type = #tpu.core_type<tc>, window_params = [{transform_indices = @transform_0, window_bounds = array<i64: 64, 128>}, {pipeline_mode = #tpu.pipeline_mode<synchronous>, transform_indices = @transform_1, window_bounds = array<i64: 1, 64>}, {pipeline_mode = #tpu.pipeline_mode<synchronous>, transform_indices = @transform_2, window_bounds = array<i64: 1, 1>}, {transform_indices = @transform_3, window_bounds = array<i64: 1, 128>}]} {
    %c0 = arith.constant 0 : index
    %c0_0 = arith.constant 0 : index
    %0 = vector.load %arg2[%c0, %c0_0] : memref<1x64xf32, #tpu.memory_space<vmem>>, vector<1x64xf32>
    %c0_1 = arith.constant 0 : index
    %c0_2 = arith.constant 0 : index
    %1 = vector.load %arg1[%c0_1, %c0_2] : memref<64x128xf32, #tpu.memory_space<vmem>>, vector<64x128xf32>
    %cst = arith.constant dense<0.000000e+00> : vector<1x128xf32>
    %2 = tpu.matmul %0, %1, %cst {dimension_numbers = #tpu.dot_dimension_numbers<[1], [0], [0], [1], [0, 0, 1, 1], [], []>} : vector<1x64xf32>, vector<64x128xf32>, vector<1x128xf32> -> vector<1x128xf32>
    %c0_3 = arith.constant 0 : index
    %c0_4 = arith.constant 0 : index
    %3 = vector.load %arg3[%c0_3, %c0_4] : memref<1x1xf32, #tpu.memory_space<vmem>>, vector<1x1xf32>
    %4 = vector.broadcast %3 : vector<1x1xf32> to vector<1x128xf32>
    %5 = arith.addf %2, %4 : vector<1x128xf32>
    %c0_5 = arith.constant 0 : index
    %c0_6 = arith.constant 0 : index
    %6 = vector.load %arg4[%c0_5, %c0_6] : memref<1x128xf32, #tpu.memory_space<vmem>>, vector<1x128xf32>
    tpu.vector_store %arg4[%c0_5, %c0_6], %5 {strides = array<i32>} : memref<1x128xf32, #tpu.memory_space<vmem>>, vector<1x128xf32>,
    return
  }
  func.func @transform_0(%arg0: i32) -> (i32, i32) {
    %c0_i32 = arith.constant 0 : i32
    %c0_i32_0 = arith.constant 0 : i32
    return %c0_i32, %arg0 : i32, i32
  }
  func.func @transform_1(%arg0: i32) -> (i32, i32) {
    %c0_i32 = arith.constant 0 : i32
    %c0_i32_0 = arith.constant 0 : i32
    %c0_i32_1 = arith.constant 0 : i32
    return %c0_i32, %c0_i32_0 : i32, i32
  }
  func.func @transform_2(%arg0: i32) -> (i32, i32) {
    %c0_i32 = arith.constant 0 : i32
    %c0_i32_0 = arith.constant 0 : i32
    %c0_i32_1 = arith.constant 0 : i32
    return %c0_i32, %c0_i32_0 : i32, i32
  }
  func.func @transform_3(%arg0: i32) -> (i32, i32) {
    %c0_i32 = arith.constant 0 : i32
    %c0_i32_0 = arith.constant 0 : i32
    return %c0_i32, %arg0 : i32, i32
  }
}

module attributes {stable_mosaic.version = 11 : i64} {
  func.func @policy_kernel(%arg0: i32, %arg1: memref<64x128xf32, #tpu.memory_space<vmem>>, %arg2: memref<1x64xf32, #tpu.memory_space<vmem>>, %arg3: memref<1x1xf32, #tpu.memory_space<vmem>>, %arg4: memref<1x128xf32, #tpu.memory_space<vmem>>) attributes {dimension_semantics = [#tpu.dimension_semantics<parallel>], iteration_bounds = array<i64: 1>, scalar_prefetch = 0 : i64, scratch_operands = 0 : i64, tpu.core_type = #tpu.core_type<tc>, window_params = [{transform_indices = @transform_0, window_bounds = array<i64: 64, 128>}, {pipeline_mode = #tpu.pipeline_mode<synchronous>, transform_indices = @transform_1, window_bounds = array<i64: 1, 64>}, {pipeline_mode = #tpu.pipeline_mode<synchronous>, transform_indices = @transform_2, window_bounds = array<i64: 1, 1>}, {transform_indices = @transform_3, window_bounds = array<i64: 1, 128>}]} {
    %c0 = arith.constant 0 : index
    %c0_0 = arith.constant 0 : index
    %0 = vector.load %arg2[%c0, %c0_0] : memref<1x64xf32, #tpu.memory_space<vmem>>, vector<1x64xf32>
    %c0_1 = arith.constant 0 : index
    %c0_2 = arith.constant 0 : index
    %1 = vector.load %arg1[%c0_1, %c0_2] : memref<64x128xf32, #tpu.memory_space<vmem>>, vector<64x128xf32>
    %cst = arith.constant dense<0.000000e+00> : vector<1x128xf32>
    %2 = tpu.matmul %0, %1, %cst {dimension_numbers = #tpu.dot_dimension_numbers<[1], [0], [0], [1], [0, 0, 1, 1], [], []>} : vector<1x64xf32>, vector<64x128xf32>, vector<1x128xf32> -> vector<1x128xf32>
    %c0_3 = arith.constant 0 : index
    %c0_4 = arith.constant 0 : index
    %3 = vector.load %arg3[%c0_3, %c0_4] : memref<1x1xf32, #tpu.memory_space<vmem>>, vector<1x1xf32>
    %4 = vector.broadcast %3 : vector<1x1xf32> to vector<1x128xf32>
    %5 = arith.addf %2, %4 : vector<1x128xf32>
    %c0_5 = arith.constant 0 : index
    %c0_6 = arith.constant 0 : index
    %6 = vector.load %arg4[%c0_5, %c0_6] : memref<1x128xf32, #tpu.memory_space<vmem>>, vector<1x128xf32>
    tpu.vector_store %arg4[%c0_5, %c0_6], %5 {strides = array<i32>} : memref<1x128xf32, #tpu.memory_space<vmem>>, vector<1x128xf32>,
    return
  }
  func.func @transform_0(%arg0: i32) -> (i32, i32) {
    %c0_i32 = arith.constant 0 : i32
    %c0_i32_0 = arith.constant 0 : i32
    return %c0_i32, %arg0 : i32, i32
  }
  func.func @transform_1(%arg0: i32) -> (i32, i32) {
    %c0_i32 = arith.constant 0 : i32
    %c0_i32_0 = arith.constant 0 : i32
    %c0_i32_1 = arith.constant 0 : i32
    return %c0_i32, %c0_i32_0 : i32, i32
  }
  func.func @transform_2(%arg0: i32) -> (i32, i32) {
    %c0_i32 = arith.constant 0 : i32
    %c0_i32_0 = arith.constant 0 : i32
    %c0_i32_1 = arith.constant 0 : i32
    return %c0_i32, %c0_i32_0 : i32, i32
  }
  func.func @transform_3(%arg0: i32) -> (i32, i32) {
    %c0_i32 = arith.constant 0 : i32
    %c0_i32_0 = arith.constant 0 : i32
    return %c0_i32, %arg0 : i32, i32
  }
}

</mosaic_0001>

<bundles_post_ra>
// kernel: squeeze.1
= control target key start
LH: loop header
LB: loop body
LE: loop exit
PB: predicated region body
PF: predicated region fallthrough
CT: control target
= control target key end

     0   :  { %s80_s0 = inlined_call_operand.vmem [shape: f32[32], index: 0, kind: input, shape index: {}]   ;;  %s81_s1 = inlined_call_operand.hbm [shape: f32[2,16], index: 1, kind: output, shape index: {}]  }
   0x1   :  { %v5_v0 = vld [vmem:[%s80_s0] sm:$0x1] }
   0x2   :  { %2 = vsyncpa [#allocation1], 0  ;;  %6 = vst [vmem:[#allocation3] sm:$0x1] %v5_v0  ;;  %vm8_vm0 = vcmask 130048   ;;  %s62_s0 = smov 112  }
   0x3   :  { %s63_s8 = smov [#allocation0]   ;;  %s27_s1 = sshll.u32 %s81_s1, 4  ;;  %s28_s1 = int_to_ptr.hbm [resolvable:$true] %s27_s1 }
   0x4   :  { %s25_s9 = sshll.u32 %s63_s8, 4  ;;  %s26_s9 = int_to_ptr.vmem [resolvable:$true] %s25_s9 }
   0x9   :  { %v10_v1 = vld [vmem:[#allocation3] sm:$0x1]  }
   0xa   :  { %v7_v2 = vld [vmem:[#allocation3] sm:$0x1]   ;;  %11 = vrot.lane.b32.xlu0 %v10_v1, %s62_s0 }
   0xb   :  { %9 = vst.msk [vmem:[#allocation2] sm:$0x1] %vm8_vm0, %v7_v2  }
  0x7c   :  { %v12_v3 = vpop.permute.xlu0 %11  }
  0x7d   :  { %15 = vst.msk [vmem:[#allocation2 + $0x1] sm:$0x1] %vm8_vm0, %v12_v3  }
  0x84   :  { %v18_v4 = vld [vmem:[#allocation2] sm:$0x3] }
  0x85   :  { %21 = vst [vmem:[#allocation0] sm:$0x3] %v18_v4 }
  0x86   :  { %30 = dma.vmem_to_hbm [thread:$0]  %s26_s9, 32, %s28_s1, [#allocation1]  }
  0x87   :  { %60 = dma.done.wait [#allocation1], 32  }
  0x88   :  { %61 = vsyncadd [#allocation1], 4294967264 }
  0x89   :  { %33 = vsyncpa [#allocation1], 1 }

// kernel: policy_model_forward.2
= control target key start
LH: loop header
LB: loop body
LE: loop exit
PB: predicated region body
PF: predicated region fallthrough
CT: control target
= control target key end

     0   :  { %v19_v2 = vlaneseq  ;;  %v159_v3 = vmov 0   ;;  %vm120_vm1 = vcmask 523264   ;;  %s229_s0 = inlined_call_operand.vmem [shape: f32[1,64], index: 0, kind: input, shape index: {}]   ;;  %s230_s1 = inlined_call_operand.<no memory space> [shape: f32[1,1], index: 1, kind: input, shape index: {}]   ;;  %s231_s2 = inlined_call_operand.vmem [shape: f32[64,32], index: 2, kind: input, shape index: {}]   ;;  %s232_s3 = inlined_call_operand.<no memory space> [shape: f32[], index: 3, kind: input, shape index: {}]   ;;  %s233_s4 = inlined_call_operand.vmem [shape: f32[1,128], index: 4, kind: output, shape index: {}]  }
   0x1   :  { %v9_v0 = vstv %s232_s3  ;;  %v10_v1 = vstv %s230_s1  ;;  %158 = vset.pattern.permute.xlu0 %v159_v3  ;;  %v155_v5 = vld [vmem:[%s231_s2 + $0x38] sm:$0xff]  ;;  %v154_v6 = vld [vmem:[%s231_s2 + $0x30] sm:$0xff] }
   0x2   :  { %11 = vst [vmem:[#allocation7] sm:$0x1] %v10_v1  ;;  %v20_v4 = vand.u32 127, %v19_v2  ;;  %v153_v8 = vld [vmem:[%s231_s2 + $0x28] sm:$0xff]  ;;  %v152_v11 = vld [vmem:[%s231_s2 + $0x20] sm:$0xff]  ;;  %v151_v13 = vld [vmem:[%s231_s2 + $0x18] sm:$0xff] }
   0x3   :  { %v150_v15 = vld [vmem:[%s231_s2 + $0x10] sm:$0xff]  ;;  %v149_v17 = vld [vmem:[%s231_s2 + $0x8] sm:$0xff]  ;;  %v18_v19 = vld [vmem:[%s231_s2] sm:$0xff] }
   0x4   :  { %vm22_vm0 = vcmp.lt.s32.totalorder %v20_v4, 32  ;;  %v104_v22 = vld [vmem:[%s229_s0] sm:$0x1] }
   0x5   :  { %v99_v9 = vsel %vm22_vm0, %v155_v5, %v9_v0  ;;  %v88_v10 = vsel %vm22_vm0, %v154_v6, %v9_v0  ;;  %v77_v12 = vsel %vm22_vm0, %v153_v8, %v9_v0  ;;  %v66_v14 = vsel %vm22_vm0, %v152_v11, %v9_v0 }
   0x6   :  { %132 = vmatpush.msra.mxu0 %v99_v9  ;;  %v55_v16 = vsel %vm22_vm0, %v151_v13, %v9_v0  ;;  %v44_v18 = vsel %vm22_vm0, %v150_v15, %v9_v0  ;;  %v33_v20 = vsel %vm22_vm0, %v149_v17, %v9_v0  ;;  %v23_v21 = vsel %vm22_vm0, %v18_v19, %v9_v0 }
   0x8   :  { %133 = vmatpush.msra.mxu0 %v88_v10 }
   0x9   :  { %v113_v7 = vld [vmem:[#allocation7] sm:$0x1] }
   0xa   :  { %116 = vperm.xlu0 %158, %v113_v7   ;;  %134 = vmatpush.msra.mxu0 %v77_v12 }
   0xc   :  { %135 = vmatpush.msra.mxu0 %v66_v14 }
   0xe   :  { %136 = vmatpush.msra.mxu0 %v55_v16 }
  0x10   :  { %137 = vmatpush.msra.mxu0 %v44_v18 }
  0x12   :  { %138 = vmatpush.msra.mxu0 %v33_v20 }
  0x14   :  { %139 = vmatpush.msra.mxu0 %v23_v21 }
  0x15   :  { %156 = vmatmul.msk.f32.vlgmr.msra.gmra.mxu0 %vm120_vm1, %v104_v22 }
  0x7c   :  { %v117_v23 = vpop.permute.xlu0 %116 }
  0x7d   :  { %v119_v24 = vperm.slane %v117_v23, 0 }
  0x92   :  { %v141_v25 = vpop.f32.mrf.mxu0 }
  0x93   :  { %v142_v26 = vadd.f32 %v141_v25, %v119_v24 }
  0x95   :  { %144 = vst [vmem:[%s233_s4] sm:$0x1] %v142_v26 }

// kernel: squeeze.1
= control target key start
LH: loop header
LB: loop body
LE: loop exit
PB: predicated region body
PF: predicated region fallthrough
CT: control target
= control target key end

     0   :  { %s80_s0 = inlined_call_operand.vmem [shape: f32[32], index: 0, kind: input, shape index: {}]   ;;  %s81_s1 = inlined_call_operand.hbm [shape: f32[2,16], index: 1, kind: output, shape index: {}]  }
   0x1   :  { %v5_v0 = vld [vmem:[%s80_s0] sm:$0x1] }
   0x2   :  { %2 = vsyncpa [#allocation1], 0  ;;  %6 = vst [vmem:[#allocation3] sm:$0x1] %v5_v0  ;;  %vm8_vm0 = vcmask 130048   ;;  %s62_s0 = smov 112  }
   0x3   :  { %s63_s8 = smov [#allocation0]   ;;  %s27_s1 = sshll.u32 %s81_s1, 4  ;;  %s28_s1 = int_to_ptr.hbm [resolvable:$true] %s27_s1 }
   0x4   :  { %s25_s9 = sshll.u32 %s63_s8, 4  ;;  %s26_s9 = int_to_ptr.vmem [resolvable:$true] %s25_s9 }
   0x9   :  { %v10_v1 = vld [vmem:[#allocation3] sm:$0x1]  }
   0xa   :  { %v7_v2 = vld [vmem:[#allocation3] sm:$0x1]   ;;  %11 = vrot.lane.b32.xlu0 %v10_v1, %s62_s0 }
   0xb   :  { %9 = vst.msk [vmem:[#allocation2] sm:$0x1] %vm8_vm0, %v7_v2  }
  0x7c   :  { %v12_v3 = vpop.permute.xlu0 %11  }
  0x7d   :  { %15 = vst.msk [vmem:[#allocation2 + $0x1] sm:$0x1] %vm8_vm0, %v12_v3  }
  0x84   :  { %v18_v4 = vld [vmem:[#allocation2] sm:$0x3] }
  0x85   :  { %21 = vst [vmem:[#allocation0] sm:$0x3] %v18_v4 }
  0x86   :  { %30 = dma.vmem_to_hbm [thread:$0]  %s26_s9, 32, %s28_s1, [#allocation1]  }
  0x87   :  { %60 = dma.done.wait [#allocation1], 32  }
  0x88   :  { %61 = vsyncadd [#allocation1], 4294967264 }
  0x89   :  { %33 = vsyncpa [#allocation1], 1 }

// kernel: policy_model_forward.1
= control target key start
LH: loop header
LB: loop body
LE: loop exit
PB: predicated region body
PF: predicated region fallthrough
CT: control target
= control target key end

     0   :  { %v64_v2 = vmov 0   ;;  %vm32_vm0 = vcmask 523264   ;;  %s118_s0 = inlined_call_operand.vmem [shape: f32[64,128], index: 0, kind: input, shape index: {}]   ;;  %s119_s2 = inlined_call_operand.<no memory space> [shape: f32[1,1], index: 2, kind: input, shape index: {}]   ;;  %s120_s1 = inlined_call_operand.vmem [shape: f32[1,64], index: 1, kind: input, shape index: {}]   ;;  %s121_s3 = inlined_call_operand.vmem [shape: f32[1,128], index: 3, kind: output, shape index: {}]  }
   0x1   :  { %v24_v0 = vld [vmem:[%s118_s0 + $0x38] sm:$0xff]  ;;  %v23_v1 = vld [vmem:[%s118_s0 + $0x30] sm:$0xff]  ;;  %63 = vset.pattern.permute.xlu0 %v64_v2  ;;  %v8_v3 = vstv %s119_s2  ;;  %v22_v4 = vld [vmem:[%s118_s0 + $0x28] sm:$0xff] }
   0x2   :  { %44 = vmatpush.msra.mxu0 %v24_v0  ;;  %9 = vst [vmem:[#allocation2] sm:$0x1] %v8_v3  ;;  %v21_v5 = vld [vmem:[%s118_s0 + $0x20] sm:$0xff]  ;;  %v20_v6 = vld [vmem:[%s118_s0 + $0x18] sm:$0xff]  ;;  %v19_v7 = vld [vmem:[%s118_s0 + $0x10] sm:$0xff] }
   0x3   :  { %v18_v9 = vld [vmem:[%s118_s0 + $0x8] sm:$0xff]  ;;  %v17_v10 = vld [vmem:[%s118_s0] sm:$0xff] }
   0x4   :  { %45 = vmatpush.msra.mxu0 %v23_v1  ;;  %v16_v11 = vld [vmem:[%s120_s1] sm:$0x1] }
   0x6   :  { %46 = vmatpush.msra.mxu0 %v22_v4 }
   0x8   :  { %47 = vmatpush.msra.mxu0 %v21_v5 }
   0x9   :  { %v25_v8 = vld [vmem:[#allocation2] sm:$0x1] }
   0xa   :  { %48 = vmatpush.msra.mxu0 %v20_v6  ;;  %28 = vperm.xlu0 %63, %v25_v8  }
   0xc   :  { %49 = vmatpush.msra.mxu0 %v19_v7 }
   0xe   :  { %50 = vmatpush.msra.mxu0 %v18_v9 }
  0x10   :  { %51 = vmatpush.msra.mxu0 %v17_v10 }
  0x11   :  { %61 = vmatmul.msk.f32.vlgmr.msra.gmra.mxu0 %vm32_vm0, %v16_v11 }
  0x7c   :  { %v29_v12 = vpop.permute.xlu0 %28 }
  0x7d   :  { %v31_v13 = vperm.slane %v29_v12, 0 }
  0x8e   :  { %v53_v14 = vpop.f32.mrf.mxu0 }
  0x8f   :  { %v54_v15 = vadd.f32 %v53_v14, %v31_v13 }
  0x91   :  { %56 = vst [vmem:[%s121_s3] sm:$0x1] %v54_v15 }

</bundles_post_ra>
